<compile_context>
chip_gen: v6e
topology: v6e:2x2x1
jax: 0.10.0
libtpu: 0.0.40
codegen_flags: <defaults>
</compile_context>

<pallas_src>
import math
import functools

import jax
import jax.numpy as jnp
from jax.experimental import pallas as pl
from jax.experimental.pallas import tpu as pltpu


# ------------------------------------------------------------------
# Buffer construction (deterministic, mirrors PyTorch __init__)
# ------------------------------------------------------------------
def make_positional_encoding_table(max_len: int, d_model: int) -> jnp.ndarray:
    """Returns pe with shape (max_len, 1, d_model), matching the PyTorch buffer."""
    position = jnp.arange(max_len, dtype=jnp.float32)[:, None]                # (max_len, 1)
    div_term = jnp.exp(
        jnp.arange(0, d_model, 2, dtype=jnp.float32) * (-math.log(10000.0) / d_model)
    )                                                                          # (d_model//2,)
    pe = jnp.zeros((max_len, d_model), dtype=jnp.float32)
    pe = pe.at[:, 0::2].set(jnp.sin(position * div_term))
    pe = pe.at[:, 1::2].set(jnp.cos(position * div_term))
    return pe[:, None, :]                                                      # (max_len, 1, d_model)


# ------------------------------------------------------------------
# Kernels
# ------------------------------------------------------------------
def _pe_add_kernel(x_ref, pe_ref, o_ref):
    # x_ref: (S, tb, D), pe_ref: (S, 1, D) — sublane broadcast over the batch tile.
    o_ref[...] = (x_ref[...] + pe_ref[...]).astype(o_ref.dtype)


def _pe_add_dropout_kernel(x_ref, pe_ref, bits_ref, o_ref, *, threshold, scale):
    # Inverted dropout: drop with prob p (bits < threshold), keep & scale by 1/(1-p).
    # Integer-threshold compare on raw uint32 bits — no int->float conversion.
    y = x_ref[...] + pe_ref[...]
    keep = bits_ref[...] >= jnp.uint32(threshold)
    o_ref[...] = jnp.where(keep, y * jnp.float32(scale), 0.0).astype(o_ref.dtype)


# ------------------------------------------------------------------
# Wrapper
# ------------------------------------------------------------------
def _choose_batch_tile(S, B, D, itemsize, target_bytes=2 * 1024 * 1024):
    """Largest batch tile (multiple of 8, or full B) keeping the x tile ~<= 2 MiB."""
    per_row = max(1, S * D * itemsize)        # bytes of one (S, 1, D) batch row
    tb = target_bytes // per_row
    if tb >= B:
        return B
    tb = max(8, (tb // 8) * 8)                # (8, 128) rule on the sublane dim
    return int(min(tb, B))


def positional_encoding_forward(x, pe, *, p=0.1, training=False, rng_key=None,
                                batch_tile=None):
    """x: (S, B, D); pe: (max_len, 1, D). Returns dropout(x + pe[:S])."""
    S, B, D = x.shape
    pe_slice = pe[:S]                         # (S, 1, D), float32 buffer

    apply_dropout = training and p > 0.0
    if apply_dropout and p >= 1.0:
        return jnp.zeros_like(x)

    itemsize = jnp.dtype(x.dtype).itemsize
    tb = int(batch_tile) if batch_tile is not None else _choose_batch_tile(S, B, D, itemsize)
    tb = min(tb, B)
    grid = (pl.cdiv(B, tb),)

    x_spec = pl.BlockSpec((S, tb, D), lambda i: (0, i, 0))
    pe_spec = pl.BlockSpec((S, 1, D), lambda i: (0, 0, 0))   # constant index -> fetched once
    out_spec = pl.BlockSpec((S, tb, D), lambda i: (0, i, 0))

    compiler_params = pltpu.CompilerParams(
        dimension_semantics=("parallel",),           # shard grid across TCs on v7x
        vmem_limit_bytes=48 * 1024 * 1024,           # explicit; < v7x 64 MiB physical
    )

    n_elem = S * B * D
    pe_bytes = S * D * jnp.dtype(pe_slice.dtype).itemsize

    if not apply_dropout:
        cost = pl.CostEstimate(
            flops=n_elem, transcendentals=0,
            bytes_accessed=2 * n_elem * itemsize + pe_bytes,
        )
        return pl.pallas_call(
            _pe_add_kernel,
            out_shape=jax.ShapeDtypeStruct((S, B, D), x.dtype),
            grid=grid,
            in_specs=[x_spec, pe_spec],
            out_specs=out_spec,
            compiler_params=compiler_params,
            cost_estimate=cost,
        )(x, pe_slice)

    # Training path: Bernoulli(keep=1-p) via uint32 bits generated outside the
    # kernel (portable to interpret mode), integer-threshold compare inside.
    # TODO(synk): dropout RNG stream cannot match torch's exactly; keep/scale
    # semantics do.
    if rng_key is None:
        rng_key = jax.random.PRNGKey(0)
    bits = jax.random.bits(rng_key, x.shape, dtype=jnp.uint32)
    bits_spec = pl.BlockSpec((S, tb, D), lambda i: (0, i, 0))

    threshold = min(int(round(float(p) * 4294967296.0)), 4294967295)
    scale = 1.0 / (1.0 - float(p))
    kernel = functools.partial(_pe_add_dropout_kernel, threshold=threshold, scale=scale)

    cost = pl.CostEstimate(
        flops=3 * n_elem, transcendentals=0,
        bytes_accessed=2 * n_elem * itemsize + n_elem * 4 + pe_bytes,
    )
    return pl.pallas_call(
        kernel,
        out_shape=jax.ShapeDtypeStruct((S, B, D), x.dtype),
        grid=grid,
        in_specs=[x_spec, pe_spec, bits_spec],
        out_specs=out_spec,
        compiler_params=compiler_params,
        cost_estimate=cost,
    )(x, pe_slice, bits)


# ------------------------------------------------------------------
# Demo / self-check
# ------------------------------------------------------------------
if __name__ == "__main__":
    d_model = 32
    max_len = 26
    seq_len = 8
    batch = 16
    p = 0.1

    key = jax.random.PRNGKey(0)
    kx, kd = jax.random.split(key)
    x = jax.random.normal(kx, (seq_len, batch, d_model), dtype=jnp.float32)
    pe = make_positional_encoding_table(max_len, d_model)

    ref = x + pe[:seq_len]

    # Eval mode (dropout identity). batch_tile=8 -> grid of 2 steps, exercises
    # the pipelined multi-block path.
    y = positional_encoding_forward(x, pe, p=p, training=False, batch_tile=8)
    y = jax.block_until_ready(y)
    assert y.shape == (seq_len, batch, d_model)
    assert jnp.allclose(y, ref, atol=1e-6), "eval-mode mismatch vs reference"

    # Auto-chosen tile (single block here since the demo is tiny).
    y_auto = positional_encoding_forward(x, pe, p=p, training=False)
    y_auto = jax.block_until_ready(y_auto)
    assert jnp.allclose(y_auto, ref, atol=1e-6), "auto-tile eval mismatch"

    # Training mode: every output element is either 0 (dropped) or ref/(1-p).
    y_tr = positional_encoding_forward(x, pe, p=p, training=True, rng_key=kd,
                                       batch_tile=8)
    y_tr = jax.block_until_ready(y_tr)
    kept_ok = jnp.isclose(y_tr, ref / (1.0 - p), atol=1e-5)
    dropped = (y_tr == 0.0)
    assert bool(jnp.all(kept_ok | dropped)), "dropout values not in {0, ref/(1-p)}"
    drop_frac = float(jnp.mean(dropped.astype(jnp.float32)))
    assert 0.0 <= drop_frac < 0.5, f"implausible drop fraction {drop_frac}"

    print("KERNEL_OK")
</pallas_src>

<mosaic_0001>
module attributes {stable_mosaic.version = 11 : i64} {
  func.func @_pe_add_kernel(%arg0: i32, %arg1: memref<8x8x32xf32, #tpu.memory_space<vmem>>, %arg2: memref<8x1x32xf32, #tpu.memory_space<vmem>>, %arg3: memref<8x8x32xf32, #tpu.memory_space<vmem>>) attributes {dimension_semantics = [#tpu.dimension_semantics<parallel>], iteration_bounds = array<i64: 2>, scalar_prefetch = 0 : i64, scratch_operands = 0 : i64, tpu.core_type = #tpu.core_type<tc>, window_params = [{transform_indices = @transform_0, window_bounds = array<i64: 8, 8, 32>}, {pipeline_mode = #tpu.pipeline_mode<synchronous>, transform_indices = @transform_1, window_bounds = array<i64: 8, 1, 32>}, {transform_indices = @transform_2, window_bounds = array<i64: 8, 8, 32>}]} {
    %c0 = arith.constant 0 : index
    %c0_0 = arith.constant 0 : index
    %c0_1 = arith.constant 0 : index
    %0 = vector.load %arg1[%c0, %c0_0, %c0_1] : memref<8x8x32xf32, #tpu.memory_space<vmem>>, vector<8x8x32xf32>
    %c0_2 = arith.constant 0 : index
    %c0_3 = arith.constant 0 : index
    %c0_4 = arith.constant 0 : index
    %1 = vector.load %arg2[%c0_2, %c0_3, %c0_4] : memref<8x1x32xf32, #tpu.memory_space<vmem>>, vector<8x1x32xf32>
    %2 = vector.broadcast %1 : vector<8x1x32xf32> to vector<8x8x32xf32>
    %3 = arith.addf %0, %2 : vector<8x8x32xf32>
    %c0_5 = arith.constant 0 : index
    %c0_6 = arith.constant 0 : index
    %c0_7 = arith.constant 0 : index
    %4 = vector.load %arg3[%c0_5, %c0_6, %c0_7] : memref<8x8x32xf32, #tpu.memory_space<vmem>>, vector<8x8x32xf32>
    tpu.vector_store %arg3[%c0_5, %c0_6, %c0_7], %3 {strides = array<i32>} : memref<8x8x32xf32, #tpu.memory_space<vmem>>, vector<8x8x32xf32>,
    return
  }
  func.func @transform_0(%arg0: i32) -> (i32, i32, i32) {
    %c0_i32 = arith.constant 0 : i32
    %c0_i32_0 = arith.constant 0 : i32
    %c0_i32_1 = arith.constant 0 : i32
    return %c0_i32, %arg0, %c0_i32_0 : i32, i32, i32
  }
  func.func @transform_1(%arg0: i32) -> (i32, i32, i32) {
    %c0_i32 = arith.constant 0 : i32
    %c0_i32_0 = arith.constant 0 : i32
    %c0_i32_1 = arith.constant 0 : i32
    %c0_i32_2 = arith.constant 0 : i32
    return %c0_i32, %c0_i32_0, %c0_i32_1 : i32, i32, i32
  }
  func.func @transform_2(%arg0: i32) -> (i32, i32, i32) {
    %c0_i32 = arith.constant 0 : i32
    %c0_i32_0 = arith.constant 0 : i32
    %c0_i32_1 = arith.constant 0 : i32
    return %c0_i32, %arg0, %c0_i32_0 : i32, i32, i32
  }
}

</mosaic_0001>

<bundles_post_ra>
// kernel: tpu_custom_call.1
= control target key start
LH: loop header
LB: loop body
LE: loop exit
PB: predicated region body
PF: predicated region fallthrough
CT: control target
= control target key end

     0   :  { %7 = vsyncpa [#allocation3], 0  ;;  %s802_s0 = inlined_call_operand.hbm [shape: f32[8,16,32], index: 0, kind: input, shape index: {}]   ;;  %s803_s1 = inlined_call_operand.hbm [shape: f32[8,1,32], index: 1, kind: input, shape index: {}]   ;;  %s804_s2 = inlined_call_operand.hbm [shape: f32[8,16,32], index: 2, kind: output, shape index: {}]  }
   0x1   :  { %9 = vsyncpa [#allocation3 + $0x1], 0 }
   0x2   :  { %10 = vsyncpa [#allocation6], 0 }
   0x3   :  { %11 = vsyncpa [#allocation4], 0 }
   0x4   :  { %13 = vsyncpa [#allocation4 + $0x1], 0  ;;  %s590_s9 = smov 0   ;;  %s592_s10 = smov 0  }
   0x5   :  { %s594_s11 = smov 0   ;;  %s596_s12 = smov 0  }
   0x6 LB: > { %s611_s13 = sadd.s32 4294967295, %s562_s12   ;;  %s353_s14 = sadd.s32 4294967294, %s562_s12   ;;  %s562_s12 = sphi %s596_s12, %s826_s12   ;;  %s558_s11 = sphi %s594_s11, %s825_s11   ;;  %s554_s10 = sphi %s592_s10, %s824_s10   ;;  %s550_s9 = sphi %s590_s9, %s823_s9  }
   0x7   : > { %s615_s15 = sadd.s32 1, %s562_s12   ;;  %s26_s16 = sadd.s32 1, %s558_s11 }
   0x8   : > { %s23_s17 = ssub.s32 %s562_s12, %s615_s15  ;;  %p33_p0 = scmp.ne.s32.totalorder %s558_s11, %s554_s10 }
   0x9   : > { %p24_p1 = scmp.eq.s32.totalorder %s23_s17, 0  ;;  %p34_p2 = scmp.eq.s32.totalorder %s562_s12, 0 }
   0xa   : > { %p39_p3 = scmp.ne.s32.totalorder %s554_s10, %s550_s9  ;;  %p808_p4 = scmp.eq.s32.totalorder %s611_s13, 0 }
   0xb   : > { %s627_s18 = scalar_select %p24_p1, %s558_s11, %s26_s16  }
   0xc   : > { %p629_p5 = por %p34_p2, %p33_p0  ;;  %p635_p6 = por %p808_p4, %p39_p3 }
   0xd   : > { %p84_p7 = scmp.eq.s32.totalorder %s611_s13, 1  ;;  %p90_p8 = scmp.eq.s32.totalorder %s353_s14, 1 }
   0xe   : > { %s810_s20 = scalar_select %p635_p6, 1, 0 }
   0xf   : > { %p354_p9 = scmp.ge.s32.totalorder %s562_s12, 1  ;;  %p97_p10 = scmp.lt.s32.totalorder %s562_s12, 3 }
  0x10   : > { %p642_p11 = por %p84_p7, %p33_p0  ;;  %p646_p12 = por %p90_p8, %p39_p3 }
  0x11   : > { %p650_p13 = pnand %p354_p9, %p97_p10  ;;  %s564_s24 = smov [#allocation5]  }
  0x12   : > { %s811_s21 = scalar_select %p642_p11, 1, 0 }
  0x13   : > { %s812_s22 = scalar_select %p646_p12, 1, 0 }
  0x14   : > { %s813_s23 = scalar_select %p650_p13, 1, 0 }
  0x15   : > { %p383_p1 = pneg %p650_p13  ;;  %s109_s25 = sshll.u32 %s564_s24, 4  ;;  %s110_s25 = int_to_ptr.vmem [resolvable:$true] %s109_s25 }
  0x16   : > { %p396_p3 = scmp.lt.s32.totalorder %s562_s12, 2  ;;  %s123_s27 = sand.u32 1, %s558_s11  }
  0x17   : > { %p658_p2 = pnand %p383_p1, %p808_p4  ;;  %s451_s28 = scalar_lea.vmem %s110_s25, 128 }
  0x18   : > { %p452_p8 = scmp.ne.s32.totalorder %s110_s25, %s451_s28  ;;  %p459_p12 = scmp.lt.s32.totalorder %s110_s25, %s110_s25 }
  0x19   : > { %p442_p7 = pneg %p658_p2  ;;  %p460_p11 = scmp.lt.s32.totalorder %s451_s28, %s451_s28 }
  0x1b   : > { %p454_p9 = pnand %p452_p8, %p442_p7  ;;  %p461_p6 = por %p460_p11, %p459_p12 }
  0x1d   : > { %p455_p10 = pneg %p454_p9 }
  0x1f   : > { %p462_p13 = pnand %p461_p6, %p455_p10 }
  0x21   : > { %465 = shalt.err (!%p462_p13)
}
  0x22   : > { %s565_s29 = smov 16   ;;  %s566_s30 = smov 1  }
  0x23   : > { %386 = dma.hbm_to_vmem [thread:$0]  (!%p658_p2), %s803_s1, 128, %s110_s25, [#allocation6], %s565_s29, %s565_s29, %s566_s30  }
  0x24   : > { %p676_p1 = pnand %p396_p3, %p629_p5  ;;  %s357_s6 = sshll.u32 %s123_s27, 6 }
  0x25   : > { %s358_s7 = sshll.u32 %s562_s12, 7  ;;  %s127_s17 = scalar_lea.vmem [#allocation2], %s357_s6 }
  0x26   : > { %s684_s16 = scalar_lea.hbm %s802_s0, %s358_s7  ;;  %s133_s24 = sshll.u32 %s127_s17, 4  ;;  %s686_s24 = int_to_ptr.vmem [resolvable:$true] %s133_s24 }
  0x27   : > { %s688_s19 = scalar_lea.sflag [#allocation3], %s123_s27  ;;  %s466_s25 = scalar_lea.hbm %s684_s16, 1024 }
  0x28   : > { %p467_p5 = scmp.ne.s32.totalorder %s684_s16, %s466_s25  ;;  %p468_p6 = pneg %p676_p1 }
  0x29   : > { %s471_s29 = scalar_lea.hbm %s802_s0, 2048  ;;  %p472_p13 = scmp.lt.s32.totalorder %s684_s16, %s802_s0 }
  0x2a   : > { %p469_p11 = pnand %p468_p6, %p467_p5  ;;  %p473_p2 = scmp.lt.s32.totalorder %s471_s29, %s466_s25 }
  0x2c   : > { %p470_p12 = pneg %p469_p11  ;;  %p474_p3 = por %p473_p2, %p472_p13 }
  0x2e   : > { %p475_p7 = pnand %p474_p3, %p470_p12 }
  0x30   : > { %478 = shalt.err (!%p475_p7)
}
  0x31   : > { %s479_s27 = scalar_lea.vmem %s686_s24, 1024  ;;  %s567_s4 = smov [#allocation2]  }
  0x32   : > { %p480_p8 = scmp.ne.s32.totalorder %s686_s24, %s479_s27  ;;  %s484_s6 = sshll.u32 %s567_s4, 4  ;;  %s485_s6 = int_to_ptr.vmem [resolvable:$false] %s484_s6 }
  0x33   : > { %s486_s7 = scalar_lea.vmem %s485_s6, 2048  ;;  %p487_p5 = scmp.lt.s32.totalorder %s686_s24, %s485_s6 }
  0x34   : > { %p482_p9 = pnand %p480_p8, %p468_p6  ;;  %p488_p11 = scmp.lt.s32.totalorder %s486_s7, %s479_s27 }
  0x36   : > { %p483_p10 = pneg %p482_p9  ;;  %p489_p0 = por %p488_p11, %p487_p5 }
  0x38   : > { %p490_p4 = pnand %p489_p0, %p483_p10 }
  0x3a   : > { %493 = shalt.err (!%p490_p4)
}
  0x3b   : > { %s568_s8 = smov 256   ;;  %s569_s14 = smov 128  }
  0x3c   : > { %s570_s17 = smov 8   ;;  %p816_p6 = scmp.ne.s32.totalorder %s813_s23, 0 }
  0x3d   : > { %390 = dma.hbm_to_vmem [thread:$0]  (!%p676_p1), %s684_s16, 1024, %s686_s24, %s688_s19, %s568_s8, %s569_s14, %s570_s17  }
  0x3e   : > { %145 = sbr.rel (%p816_p6) target bundleno = 100 (0x64), region = 28  ;;  %s712_s25 = sand.u32 (!%p816_p6), 1, %s554_s10  }
  0x3f   : > { %s360_s26 = sshll.u32 (!%p816_p6), %s712_s25, 6  ;;  %s148_s28 = scalar_lea.sflag (!%p816_p6), [#allocation3], %s712_s25 }
  0x40   : > { %s716_s29 = scalar_lea.vmem (!%p816_p6), [#allocation2], %s360_s26  ;;  %p817_p4 = scmp.ne.s32.totalorder (!%p816_p6), %s810_s20, 0 }
  0x43   : > { %537 = dma.done.wait (%p817_p4), %s148_s28, 1024  }
  0x44   : > { %539 = vsyncadd (%p817_p4), %s148_s28, 4294966272  ;;  %p818_p0 = scmp.eq.s32.totalorder %s611_s13, 0 }
  0x46   : > { %541 = dma.done.wait (%p818_p0), [#allocation6], 128   ;;  %p819_p1 = pmov %p818_p0 }
  0x47   : > { %v176_v0 = vld [vmem:[%s716_s29] sm:$0xff]  ;;  %vm248_vm0 = vcmask 261120   ;;  %v177_v2 = vld [vmem:[%s716_s29 + $0x8] sm:$0xff]  ;;  %s728_s20 = scalar_lea.vmem [#allocation7], %s360_s26  ;;  %v178_v5 = vld [vmem:[%s716_s29 + $0x10] sm:$0xff]  ;;  %s372_s5 = sshll.u32 %s611_s13, 7 }
  0x48   : > { %543 = vsyncadd (%p819_p1), [#allocation6], 4294967168  ;;  %v363_v1 = vld [vmem:[#allocation5] ss:$0 sm:$0xff]  ;;  %s270_s23 = sshll.u32 %s728_s20, 4  ;;  %v179_v9 = vld [vmem:[%s716_s29 + $0x18] sm:$0xff]  ;;  %s751_s24 = scalar_lea.hbm %s804_s2, %s372_s5  ;;  %s738_s23 = int_to_ptr.vmem [resolvable:$true] %s270_s23 }
  0x49   : > { %v240_v3 = vadd.f32 %v363_v1, %v176_v0  ;;  %v364_v4 = vld [vmem:[#allocation5 + $0x1] ss:$0 sm:$0xff]  ;;  %v365_v6 = vld [vmem:[#allocation5 + $0x2] ss:$0 sm:$0xff]  ;;  %v366_v10 = vld [vmem:[#allocation5 + $0x3] ss:$0 sm:$0xff] }
  0x4a   : > { %v241_v7 = vadd.f32 %v364_v4, %v177_v2  ;;  %v242_v8 = vadd.f32 %v365_v6, %v178_v5  ;;  %v180_v11 = vld [vmem:[%s716_s29 + $0x20] sm:$0xff]  ;;  %v243_v12 = vadd.f32 %v366_v10, %v179_v9  ;;  %v181_v14 = vld [vmem:[%s716_s29 + $0x28] sm:$0xff]  ;;  %v182_v18 = vld [vmem:[%s716_s29 + $0x30] sm:$0xff]  ;;  %s258_s19 = scalar_lea.sflag [#allocation4], %s712_s25  ;;  %s494_s30 = scalar_lea.vmem %s738_s23, 1024 }
  0x4b   : > { %249 = vst.msk [vmem:[%s728_s20] sm:$0xff] %vm248_vm0, %v240_v3  ;;  %v367_v13 = vld [vmem:[#allocation5 + $0x4] ss:$0 sm:$0xff]  ;;  %v368_v15 = vld [vmem:[#allocation5 + $0x5] ss:$0 sm:$0xff]  ;;  %v183_v20 = vld [vmem:[%s716_s29 + $0x38] sm:$0xff]  ;;  %p495_p12 = scmp.ne.s32.totalorder %s738_s23, %s494_s30 }
  0x4c   : > { %250 = vst.msk [vmem:[%s728_s20 + $0x8] sm:$0xff] %vm248_vm0, %v241_v7  ;;  %251 = vst.msk [vmem:[%s728_s20 + $0x10] sm:$0xff] %vm248_vm0, %v242_v8  ;;  %v244_v16 = vadd.f32 %v367_v13, %v180_v11  ;;  %v245_v17 = vadd.f32 %v368_v15, %v181_v14  ;;  %v369_v19 = vld [vmem:[#allocation5 + $0x6] ss:$0 sm:$0xff]  ;;  %v370_v22 = vld [vmem:[#allocation5 + $0x7] ss:$0 sm:$0xff] }
  0x4d   : > { %252 = vst.msk [vmem:[%s728_s20 + $0x18] sm:$0xff] %vm248_vm0, %v243_v12  ;;  %v246_v21 = vadd.f32 %v369_v19, %v182_v18  ;;  %v247_v23 = vadd.f32 %v370_v22, %v183_v20  ;;  %p820_p13 = scmp.ne.s32.totalorder %s811_s21, 0  ;;  %s571_s3 = smov [#allocation7]  }
  0x4e   : > { %253 = vst.msk [vmem:[%s728_s20 + $0x20] sm:$0xff] %vm248_vm0, %v244_v16  ;;  %254 = vst.msk [vmem:[%s728_s20 + $0x28] sm:$0xff] %vm248_vm0, %v245_v17  ;;  %s498_s27 = sshll.u32 %s571_s3, 4  ;;  %s499_s27 = int_to_ptr.vmem [resolvable:$false] %s498_s27 }
  0x4f   : > { %255 = vst.msk [vmem:[%s728_s20 + $0x30] sm:$0xff] %vm248_vm0, %v246_v21  ;;  %256 = vst.msk [vmem:[%s728_s20 + $0x38] sm:$0xff] %vm248_vm0, %v247_v23  ;;  %p496_p2 = pnand %p495_p12, %p820_p13  ;;  %s500_s4 = scalar_lea.vmem %s499_s27, 2048 }
  0x50   : > { %p501_p7 = scmp.lt.s32.totalorder %s738_s23, %s499_s27  ;;  %p502_p8 = scmp.lt.s32.totalorder %s500_s4, %s494_s30 }
  0x51   : > { %p497_p3 = pneg %p496_p2 }
  0x52   : > { %p503_p9 = por %p502_p8, %p501_p7 }
  0x54   : > { %p504_p10 = pnand %p503_p9, %p497_p3 }
  0x56   : > { %507 = shalt.err (!%p504_p10)
}
  0x57   : > { %s508_s6 = scalar_lea.hbm %s751_s24, 1024  ;;  %s512_s14 = scalar_lea.hbm %s804_s2, 2048 }
  0x58   : > { %p509_p5 = scmp.ne.s32.totalorder %s751_s24, %s508_s6  ;;  %p513_p4 = scmp.lt.s32.totalorder %s751_s24, %s804_s2 }
  0x59   : > { %p514_p0 = scmp.lt.s32.totalorder %s512_s14, %s508_s6 }
  0x5a   : > { %p510_p11 = pnand %p509_p5, %p820_p13 }
  0x5b   : > { %p515_p1 = por %p514_p0, %p513_p4 }
  0x5c   : > { %p511_p6 = pneg %p510_p11 }
  0x5e   : > { %p516_p12 = pnand %p515_p1, %p511_p6 }
  0x60   : > { %519 = shalt.err (!%p516_p12)
}
  0x61   : > { %s572_s28 = smov 128   ;;  %s573_s29 = smov 256  }
  0x62   : > { %s574_s20 = smov 8  }
  0x63   : > { %381 = dma.vmem_to_hbm [thread:$0]  (%p820_p13), %s738_s23, 1024, %s751_s24, %s258_s19, %s572_s28, %s573_s29, %s574_s20  }
  0x64 PF: > { %s285_s5 = sand.u32 1, %s550_s9   ;;  %p821_p2 = scmp.ne.s32.totalorder %s812_s22, 0 }
  0x65   : > { %p822_p3 = scmp.ge.s32.totalorder %s562_s12, 2  ;;  %s286_s13 = scalar_lea.sflag [#allocation4], %s285_s5 }
  0x67   : > { %p392_p7 = pnand %p822_p3, %p821_p2 }
  0x69   : > { %p393_p8 = pneg %p392_p7 }
  0x6b   : > { %545 = dma.done.wait (%p393_p8), %s286_s13, 1024  }
  0x6c   : > { %547 = vsyncadd (%p393_p8), %s286_s13, 4294966272  ;;  %p16_p9 = scmp.ge.s32.totalorder %s615_s15, 4   ;;  %s823_s9 = smov %s554_s10 }
  0x6d   : > { %s824_s10 = smov %s558_s11  ;;  %s825_s11 = smov %s627_s18 }
  0x6e   : > { %s826_s12 = smov %s615_s15  ;;  %18 = sbr.rel (!%p16_p9) target bundleno = 6 (0x6), region = 77 }
  0x73   :  { %291 = vsyncpa [#allocation3], 1 }
  0x74   :  { %293 = vsyncpa [#allocation3 + $0x1], 1 }
  0x75   :  { %294 = vsyncpa [#allocation6], 1 }
  0x76   :  { %295 = vsyncpa [#allocation4], 1 }
  0x77   :  { %297 = vsyncpa [#allocation4 + $0x1], 1 }

</bundles_post_ra>
